<compile_context>
chip_gen: v7x
topology: tpu7x:2x2x1
jax: 0.10.0
libtpu: 0.0.40
codegen_flags: <defaults>
</compile_context>

<pallas_src>
import jax
import jax.numpy as jnp
from jax.experimental import pallas as pl
from jax.experimental.pallas import tpu as pltpu

DENSE_NUM = 13   # hard-coded in the PyTorch module (x[:, :13], feature_to_field)
EMB_DIM = 8      # nn.Embedding(num, 8) is hard-coded; emb_dim must equal 8


def _round_up(x, m):
    return ((x + m - 1) // m) * m


def _cdiv(a, b):
    return (a + b - 1) // b


# ---------------------------------------------------------------------------
# Pallas kernel: sigmoid( sum_j a_j * (a @ W_ext)_j + b )
#   feat_ref   : (TB, F1)     bf16   streamed batch tile (F1 = F + 1, last col = 1)
#   w_pair_ref : (F1, F1)     bf16   VMEM-resident pair weights (+ folded linear row)
#   b_ref      : (1,)         f32    SMEM scalar bias
#   out_ref    : (1, 1, TB)   f32    lane-dense output row
# ---------------------------------------------------------------------------
def ffm_kernel(feat_ref, w_pair_ref, b_ref, out_ref):
    a = feat_ref[...]                                                    # (TB, F1) bf16
    # Pairwise interaction (+ folded linear head) on the MXU, f32 accumulate.
    t = jnp.dot(a, w_pair_ref[...], preferred_element_type=jnp.float32)  # (TB, F1) f32
    z = a.astype(jnp.float32) * t                                        # (TB, F1) f32 (VPU)
    # Row reduction as a second tiny MXU contraction over the feature axis so
    # the result is produced lane-dense as (1, TB) -- no masked (TB, 1) store.
    ones_row = jnp.ones((1, z.shape[-1]), jnp.float32)
    s = jnp.einsum("of,bf->ob", ones_row, z,
                   preferred_element_type=jnp.float32)                   # (1, TB)
    out_ref[0] = jax.nn.sigmoid(s + b_ref[0])                            # (1, TB)


# ---------------------------------------------------------------------------
# Parameter-time glue: field-aware pair-weight matrix (+ folded linear head).
# Runs once at parameter-load time, not per forward call.
# ---------------------------------------------------------------------------
def _build_pair_weights(field_matrix, F):
    # feature_to_field(n) = n if n < 13 else (n - 13) // emb_dim + 13
    field_idx = jnp.array(
        [n if n < DENSE_NUM else (n - DENSE_NUM) // EMB_DIM + DENSE_NUM
         for n in range(F)],
        dtype=jnp.int32)
    # A[i, j, :] = field_matrix[i, field(j), :]
    A = field_matrix[jnp.arange(F)[:, None], field_idx[None, :], :]
    w_full = jnp.einsum("ijd,jid->ij", A, A)            # W[i,j] = <fm[i,f(j)], fm[j,f(i)]>
    return jnp.triu(w_full, k=1).astype(jnp.float32)    # only i < j


def prepare_ffm_weights(params):
    S = len(params["emb_tables"])
    F = DENSE_NUM + S * EMB_DIM
    F1 = F + 1                                           # +1 constant-1 feature column

    w_pair = _build_pair_weights(params["field_matrix"], F)                 # (F, F)
    w_ext = jnp.zeros((F1, F1), jnp.float32)
    w_ext = w_ext.at[:F, :F].set(w_pair)
    w_ext = w_ext.at[F, :F].set(params["w_lin"].astype(jnp.float32)[0])     # linear head

    b = jnp.asarray(params["b_lin"], jnp.float32).reshape(1)
    return {"F": F, "F1": F1, "w_pair": w_ext.astype(jnp.bfloat16), "b": b}


# ---------------------------------------------------------------------------
# Per-call path: embedding gather + concat (+ constant-1 column), bf16 cast,
# minimal batch padding, then the Pallas kernel.
# ---------------------------------------------------------------------------
def _build_features_bf16(x, emb_tables, batch_pad_to):
    B = x.shape[0]
    dense = x[:, :DENSE_NUM].astype(jnp.float32)
    sparse_idx = x[:, DENSE_NUM:].astype(jnp.int32)
    embs = [emb_tables[i][sparse_idx[:, i]] for i in range(len(emb_tables))]
    ones = jnp.ones((B, 1), jnp.float32)                 # carries the folded linear head
    feat = jnp.concatenate([dense] + embs + [ones], axis=1).astype(jnp.bfloat16)
    if batch_pad_to != B:
        feat = jnp.pad(feat, ((0, batch_pad_to - B), (0, 0)))
    return feat                                          # (Bp, F1) bf16


def ffm_forward(x, emb_tables, prepared):
    B = x.shape[0]
    F1 = prepared["F1"]

    # Batch tiling: big tiles (<=2048 rows) amortize per-step overhead; round to
    # 16 for bf16 sublane packing; force >=2 grid steps when the batch allows so
    # both v7x TensorCores are used (no effect on single-TC v5e/v6e).
    TB_CAP = 2048
    if B <= 16:
        nsteps = 1
        TB = _round_up(max(B, 1), 16)
    else:
        nsteps = max(2, _cdiv(B, TB_CAP))
        TB = _round_up(_cdiv(B, nsteps), 16)
    Bp = nsteps * TB

    feat = _build_features_bf16(x, emb_tables, Bp)       # (Bp, F1) bf16, no lane padding

    # Realistic VMEM budget: streamed tile (x2 buffers) + resident weights +
    # output row + f32 intermediates, plus compiler scratch headroom.
    vmem_bytes = int(2 * TB * F1 * 2        # feat tile, double-buffered bf16
                     + 2 * F1 * F1 * 2      # resident pair weights (2 buffers)
                     + 2 * TB * 4           # lane-dense output row (2 buffers)
                     + 8 * TB * F1 * 4      # f32 intermediates headroom
                     + (16 << 20))          # compiler pipelining/spill headroom

    cost = pl.CostEstimate(
        flops=2 * Bp * F1 * F1 + 3 * Bp * F1,
        transcendentals=Bp,
        bytes_accessed=Bp * F1 * 2 + F1 * F1 * 2 + Bp * 4)

    out = pl.pallas_call(
        ffm_kernel,
        out_shape=jax.ShapeDtypeStruct((nsteps, 1, TB), jnp.float32),
        grid=(nsteps,),
        in_specs=[
            pl.BlockSpec((TB, F1), lambda i: (i, 0)),            # streamed batch tile (full F1)
            pl.BlockSpec((F1, F1), lambda i: (0, 0)),            # VMEM-resident pair weights
            pl.BlockSpec(memory_space=pltpu.MemorySpace.SMEM),   # scalar bias
        ],
        out_specs=pl.BlockSpec((1, 1, TB), lambda i: (i, 0, 0)),  # lane-dense output row
        compiler_params=pltpu.CompilerParams(
            dimension_semantics=("parallel",),
            vmem_limit_bytes=vmem_bytes,
        ),
        cost_estimate=cost,
    )(feat, prepared["w_pair"], prepared["b"])

    # NOTE: PyTorch casts to float64; TPU has no native f64 -> return f32.
    return out.reshape(-1)[:B]


def ffm_reference(x, params):
    """Pure-JAX f32 reference mirroring the PyTorch forward."""
    dense = x[:, :DENSE_NUM].astype(jnp.float32)
    sparse_idx = x[:, DENSE_NUM:].astype(jnp.int32)
    embs = [params["emb_tables"][i][sparse_idx[:, i]]
            for i in range(len(params["emb_tables"]))]
    feat = jnp.concatenate([dense] + embs, axis=1)
    F = feat.shape[1]
    w_pair = _build_pair_weights(params["field_matrix"], F)
    inter = jnp.einsum("bi,ij,bj->b", feat, w_pair, feat)
    lin = feat @ params["w_lin"].astype(jnp.float32)[0] + params["b_lin"].astype(jnp.float32)[0]
    return jax.nn.sigmoid(lin + inter)


# ---------------------------------------------------------------------------
if __name__ == "__main__":
    key = jax.random.PRNGKey(0)
    feature_columns = [10, 20, 30]          # 3 sparse features
    S = len(feature_columns)
    F = DENSE_NUM + S * EMB_DIM             # 13 + 24 = 37
    field_num = DENSE_NUM + S               # 16
    B = 2

    keys = jax.random.split(key, 2 * S + 4)

    # deterministic parameter init (shapes from the module's __init__)
    emb_tables = [
        0.1 * jax.random.normal(keys[i], (feature_columns[i], EMB_DIM), jnp.float32)
        for i in range(S)
    ]
    w_lin = 0.1 * jax.random.normal(keys[S], (1, F), jnp.float32)
    b_lin = jnp.full((1,), 0.05, jnp.float32)
    field_matrix = 0.1 * jax.random.normal(
        keys[S + 1], (F, field_num, EMB_DIM), jnp.float32)

    params = {
        "emb_tables": emb_tables,
        "w_lin": w_lin,
        "b_lin": b_lin,
        "field_matrix": field_matrix,
    }

    # example input: 13 dense values + 3 sparse indices (stored as floats, like
    # the PyTorch model which casts x[:, 13:] to long)
    dense = jax.random.normal(keys[S + 2], (B, DENSE_NUM), jnp.float32)
    sparse = jnp.stack(
        [jax.random.randint(keys[S + 3 + i], (B,), 0, feature_columns[i])
         for i in range(S)],
        axis=1)
    x = jnp.concatenate([dense, sparse.astype(jnp.float32)], axis=1)  # (2, 16)

    # parameter-time preparation (hoisted out of the per-call path)
    prepared = prepare_ffm_weights(params)

    y = ffm_forward(x, emb_tables, prepared)
    jax.block_until_ready(y)

    y_ref = ffm_reference(x, params)
    assert y.dtype == jnp.float32 and y.shape == (B,)
    # bf16 MXU operands (f32 accumulate) -> loosened tolerance vs f32 reference
    assert jnp.allclose(y, y_ref, rtol=3e-2, atol=3e-3), (y, y_ref)

    print("KERNEL_OK")
</pallas_src>

<mosaic_0001>
module attributes {stable_mosaic.version = 11 : i64} {
  func.func @ffm_kernel(%arg0: i32, %arg1: memref<16x38xbf16, #tpu.memory_space<vmem>>, %arg2: memref<38x38xbf16, #tpu.memory_space<vmem>>, %arg3: memref<1xf32, #tpu.memory_space<smem>>, %arg4: memref<1x1x16xf32, #tpu.memory_space<vmem>>) attributes {dimension_semantics = [#tpu.dimension_semantics<parallel>], iteration_bounds = array<i64: 1>, scalar_prefetch = 0 : i64, scratch_operands = 0 : i64, tpu.core_type = #tpu.core_type<tc>, window_params = [{transform_indices = @transform_0, window_bounds = array<i64: 16, 38>}, {pipeline_mode = #tpu.pipeline_mode<synchronous>, transform_indices = @transform_1, window_bounds = array<i64: 38, 38>}, {transform_indices = @transform_2, window_bounds = array<i64: 1>}, {transform_indices = @transform_3, window_bounds = array<i64: 1, 1, 16>}]} {
    %c0 = arith.constant 0 : index
    %c0_0 = arith.constant 0 : index
    %0 = vector.load %arg1[%c0, %c0_0] : memref<16x38xbf16, #tpu.memory_space<vmem>>, vector<16x38xbf16>
    %c0_1 = arith.constant 0 : index
    %c0_2 = arith.constant 0 : index
    %1 = vector.load %arg2[%c0_1, %c0_2] : memref<38x38xbf16, #tpu.memory_space<vmem>>, vector<38x38xbf16>
    %cst = arith.constant dense<0.000000e+00> : vector<16x38xf32>
    %2 = tpu.matmul %0, %1, %cst {dimension_numbers = #tpu.dot_dimension_numbers<[1], [0], [0], [1], [0, 0, 1, 1], [], []>} : vector<16x38xbf16>, vector<38x38xbf16>, vector<16x38xf32> -> vector<16x38xf32>
    %3 = arith.extf %0 : vector<16x38xbf16> to vector<16x38xf32>
    %4 = arith.mulf %3, %2 : vector<16x38xf32>
    %cst_3 = arith.constant 1.000000e+00 : f32
    %5 = vector.broadcast %cst_3 : f32 to vector<1x38xf32>
    "tpu.trace_start"() <{level = 10 : i32, message = "of,bf->ob"}> : () -> ()
    %cst_4 = arith.constant dense<0.000000e+00> : vector<1x16xf32>
    %6 = tpu.matmul %5, %4, %cst_4 {dimension_numbers = #tpu.dot_dimension_numbers<[1], [1], [0], [0], [0, 0, 1, 0], [], []>} : vector<1x38xf32>, vector<16x38xf32>, vector<1x16xf32> -> vector<1x16xf32>
    "tpu.trace_stop"() : () -> ()
    %c0_5 = arith.constant 0 : index
    %7 = memref.load %arg3[%c0_5] : memref<1xf32, #tpu.memory_space<smem>>
    %8 = vector.broadcast %7 : f32 to vector<1x16xf32>
    %9 = arith.addf %6, %8 : vector<1x16xf32>
    %10 = arith.negf %9 : vector<1x16xf32>
    %11 = math.exp %10 : vector<1x16xf32>
    %cst_6 = arith.constant 1.000000e+00 : f32
    %12 = vector.broadcast %cst_6 : f32 to vector<1x16xf32>
    %13 = arith.addf %12, %11 : vector<1x16xf32>
    %14 = arith.divf %12, %13 : vector<1x16xf32>
    %c0_7 = arith.constant 0 : index
    %c0_8 = arith.constant 0 : index
    %c0_9 = arith.constant 0 : index
    %15 = vector.load %arg4[%c0_7, %c0_8, %c0_9] : memref<1x1x16xf32, #tpu.memory_space<vmem>>, vector<1x1x16xf32>
    %16 = vector.shape_cast %15 : vector<1x1x16xf32> to vector<1x16xf32>
    %17 = vector.shape_cast %14 : vector<1x16xf32> to vector<1x1x16xf32>
    tpu.vector_store %arg4[%c0_7, %c0_8, %c0_9], %17 {strides = array<i32>} : memref<1x1x16xf32, #tpu.memory_space<vmem>>, vector<1x1x16xf32>,
    return
  }
  func.func @transform_0(%arg0: i32) -> (i32, i32) {
    %c0_i32 = arith.constant 0 : i32
    %c0_i32_0 = arith.constant 0 : i32
    return %arg0, %c0_i32 : i32, i32
  }
  func.func @transform_1(%arg0: i32) -> (i32, i32) {
    %c0_i32 = arith.constant 0 : i32
    %c0_i32_0 = arith.constant 0 : i32
    %c0_i32_1 = arith.constant 0 : i32
    return %c0_i32, %c0_i32_0 : i32, i32
  }
  func.func @transform_2(%arg0: i32) -> i32 {
    %c0_i32 = arith.constant 0 : i32
    %c0_i32_0 = arith.constant 0 : i32
    return %c0_i32 : i32
  }
  func.func @transform_3(%arg0: i32) -> (i32, i32, i32) {
    %c0_i32 = arith.constant 0 : i32
    %c0_i32_0 = arith.constant 0 : i32
    %c0_i32_1 = arith.constant 0 : i32
    return %arg0, %c0_i32, %c0_i32_0 : i32, i32, i32
  }
}

</mosaic_0001>

<bundles_post_ra>
// kernel: tpu_custom_call.1
= control target key start
LH: loop header
LB: loop body
LE: loop exit
PB: predicated region body
PF: predicated region fallthrough
CT: control target
= control target key end

     0   :  { %9 = vsyncpa [#allocation4], 0  ;;  %s429_s0 = inlined_call_operand.hbm [shape: bf16[16,38], index: 0, kind: input, shape index: {}]   ;;  %s430_s1 = inlined_call_operand.hbm [shape: bf16[38,38], index: 1, kind: input, shape index: {}]   ;;  %s431_s2 = inlined_call_operand.<no memory space> [shape: f32[1], index: 2, kind: input, shape index: {}]   ;;  %s432_s3 = inlined_call_operand.hbm [shape: f32[1,1,16], index: 3, kind: output, shape index: {}]  }
   0x1   :  { %10 = vsyncpa [#allocation7], 0 }
   0x2   :  { %11 = vsyncpa [#allocation5], 0  ;;  %s357_s12 = smov [#allocation3]   ;;  %s285_s16 = scalar_lea.hbm %s429_s0, 128 }
   0x3   :  { %s17_s13 = sshll.u32 %s357_s12, 4  ;;  %p286_p0 = scmp.ne.s32.totalorder %s429_s0, %s285_s16  ;;  %s18_s13 = int_to_ptr.vmem [resolvable:$true] %s17_s13 }
   0x4   :  { %p289_p1 = scmp.lt.u32.totalorder %s285_s16, %s429_s0 }
   0x6   :  { %p291_p2 = pnand %p289_p1, %p286_p0 }
   0x8   :  { %294 = shalt.err (!%p291_p2)
}
   0x9   :  { %s295_s21 = scalar_lea.vmem %s18_s13, 128  ;;  %p300_p4 = scmp.lt.s32.totalorder %s18_s13, %s18_s13 }
   0xa   :  { %p296_p3 = scmp.ne.s32.totalorder %s18_s13, %s295_s21  ;;  %p301_p5 = scmp.lt.s32.totalorder %s295_s21, %s295_s21 }
   0xc   :  { %p302_p6 = por %p301_p5, %p300_p4 }
   0xe   :  { %p303_p7 = pnand %p302_p6, %p296_p3 }
  0x10   :  { %306 = shalt.err (!%p303_p7)
}
  0x11   :  { %s358_s22 = smov 64   ;;  %s359_s23 = smov 4  }
  0x12   :  { %23 = dma.hbm_to_vmem [thread:$0]  %s429_s0, 128, %s18_s13, [#allocation4], %s358_s22, %s358_s22, %s359_s23  }
  0x13   :  { %s360_s26 = smov [#allocation6]   ;;  %s307_s30 = scalar_lea.hbm %s430_s1, 320 }
  0x14   :  { %s29_s27 = sshll.u32 %s360_s26, 4  ;;  %p308_p8 = scmp.ne.s32.totalorder %s430_s1, %s307_s30  ;;  %s30_s27 = int_to_ptr.vmem [resolvable:$true] %s29_s27 }
  0x15   :  { %p311_p9 = scmp.lt.u32.totalorder %s307_s30, %s430_s1 }
  0x17   :  { %p313_p10 = pnand %p311_p9, %p308_p8 }
  0x19   :  { %316 = shalt.err (!%p313_p10)
}
  0x1a   :  { %s317_s8 = scalar_lea.vmem %s30_s27, 320  ;;  %p322_p12 = scmp.lt.s32.totalorder %s30_s27, %s30_s27 }
  0x1b   :  { %p318_p11 = scmp.ne.s32.totalorder %s30_s27, %s317_s8  ;;  %p323_p13 = scmp.lt.s32.totalorder %s317_s8, %s317_s8 }
  0x1d   :  { %p324_p0 = por %p323_p13, %p322_p12 }
  0x1f   :  { %p325_p1 = pnand %p324_p0, %p318_p11 }
  0x21   :  { %328 = shalt.err (!%p325_p1)
}
  0x22   :  { %35 = dma.hbm_to_vmem [thread:$0]  %s430_s1, 320, %s30_s27, [#allocation7], %s358_s22, %s358_s22, %s359_s23  }
  0x23   :  { %351 = dma.done.wait [#allocation4], 128  }
  0x24   :  { %352 = vsyncadd [#allocation4], 4294967168 }
  0x25   :  { %353 = dma.done.wait [#allocation7], 320  }
  0x26   :  { %354 = vsyncadd [#allocation7], 4294966976  ;;  %v361_v0 = vmov 0.0   ;;  %vm362_vm0 = vmmov 0   ;;  %v276_v1 = vld [vmem:[#allocation6] sm:$0xff]   ;;  %v277_v2 = vld [vmem:[#allocation6 + $0x8] sm:$0xff]   ;;  %v126_v17 = vstv %s431_s2 }
  0x27   :  { %246 = vmatprep.subr.bf16.mxu0 %v361_v0  ;;  %252 = vmatprep.mubr.msk.bf16.mxu0 %vm362_vm0, %v361_v0  ;;  %v278_v3 = vld [vmem:[#allocation6 + $0x10] ss:$0 sps:$4 sm:$0x77]   ;;  %vm76_vm1 = vcmask 1042432   ;;  %v45_v4 = vld [vmem:[#allocation3] sm:$0xff]   ;;  %vm72_vm2 = vcmask 310272  }
  0x28   :  { %260 = vmatprep.mubr.msk.f32.mxu1 %vm362_vm0, %v361_v0  ;;  %247 = vmatpush3.bf16.msra.mxu0 %v276_v1  ;;  %v78_v5 = vsel %vm76_vm1, %v278_v3, 0  ;;  %v363_v6 = vmov 0.0|0.0   ;;  %v121_v7 = vunpack.c.l.bf16 %v45_v4  ;;  %v122_v8 = vunpack.c.h.bf16 %v45_v4  ;;  %vm265_vm3 = vmpackc.low %vm72_vm2, %vm72_vm2  ;;  %s365_s11 = smov [#allocation8]  }
  0x29   :  { %248 = vmatprep.subr.bf16.mxu0 %v361_v0  ;;  %263 = vmatprep.subr.bf16.mxu1 %v363_v6  ;;  %v364_v16 = vmov 1.0   ;;  %s220_s12 = sshll.u32 %s365_s11, 4  ;;  %vm212_vm4 = vcmask 122880   ;;  %s221_s12 = int_to_ptr.vmem [resolvable:$true] %s220_s12 }
  0x2a   :  { %s329_s13 = scalar_lea.vmem %s221_s12, 16  ;;  %s333_s14 = scalar_lea.vmem %s221_s12, 32 }
  0x2b   :  { %p330_p2 = scmp.ne.s32.totalorder %s221_s12, %s329_s13  ;;  %p334_p3 = scmp.lt.s32.totalorder %s221_s12, %s221_s12 }
  0x2c   :  { %249 = vmatpush3.bf16.msra.mxu0 %v277_v2  ;;  %p335_p4 = scmp.lt.s32.totalorder %s333_s14, %s329_s13 }
  0x2d   :  { %250 = vmatprep.subr.bf16.mxu0 %v361_v0 }
  0x2e   :  { %p336_p5 = por %p335_p4, %p334_p3 }
  0x30   :  { %251 = vmatpush3.bf16.msra.mxu0 %v78_v5  ;;  %p337_p6 = pnand %p336_p5, %p330_p2 }
  0x33   :  { %253 = vmatmul.mubr.msk.bf16.vlgmr.msra.gmra.mrb[0].mxu0 %vm72_vm2, %v45_v4 }
 0x106   :  { %v114_v9 = vpop.f32.mrb[0].mxu0 }
 0x107   :  { %v254_v10 = vpop.f32.mrb[1].mxu0  ;;  %v123_v12 = vmul.f32 %v121_v7, %v114_v9 }
 0x108   :  { %v117_v11 = vpop.f32.mrb[2].mxu0 }
 0x109   :  { %v124_v13 = vmul.f32 %v122_v8, %v117_v11  ;;  %v255_v14 = vpop.f32.mrb[3].mxu0 }
 0x10b   :  { %v264_v15 = vpack.c.bf16 %v124_v13, %v123_v12 }
 0x10d   :  { %266 = vmatpush3.bf16.xpose.msk.msra.mxu1 %vm265_vm3, %v264_v15 }
 0x114   :  { %261 = vmatmul.mubr.msk.f32.vlgmr.msra.gmra.mrb[0].mxu1 %vm72_vm2, %v364_v16 }
 0x1e7   :  { %v202_v18 = vpop.f32.mrb[0].mxu1 }
 0x1e8   :  { %v203_v19 = vadd.f32 %v202_v18, %v126_v17  ;;  %v262_v20 = vpop.f32.mrb[1].mxu1 }
 0x1ea   :  { %v238_v21 = vmul.f32 -1.442695, %v203_v19 }
 0x1ec   :  { %281 = vpow2.f32 %v238_v21 }
 0x1f6   :  { %v282_v22 = vpop.eup %281 }
 0x1f7   :  { %v209_v23 = vadd.f32 1.0, %v282_v22 }
 0x1f9   :  { %283 = vrcp.f32 %v209_v23 }
 0x203   :  { %v284_v24 = vpop.eup %283 }
 0x204   :  { %213 = vst.msk [vmem:[#allocation8] sm:$0x1] %vm212_vm4, %v284_v24 }
 0x205   :  { %340 = shalt.err (!%p337_p6)
}
 0x206   :  { %s341_s16 = scalar_lea.hbm %s432_s3, 16 }
 0x207   :  { %p342_p7 = scmp.ne.s32.totalorder %s432_s3, %s341_s16  ;;  %p345_p8 = scmp.lt.u32.totalorder %s341_s16, %s432_s3 }
 0x209   :  { %p347_p9 = pnand %p345_p8, %p342_p7 }
 0x20b   :  { %350 = shalt.err (!%p347_p9)
}
 0x20c   :  { %223 = dma.vmem_to_hbm [thread:$0]  %s221_s12, 16, %s432_s3, [#allocation5]  }
 0x20d   :  { %355 = dma.done.wait [#allocation5], 16  }
 0x20e   :  { %356 = vsyncadd [#allocation5], 4294967280 }
 0x20f   :  { %227 = vsyncpa [#allocation4], 1 }
 0x210   :  { %228 = vsyncpa [#allocation7], 1 }
 0x211   :  { %229 = vsyncpa [#allocation5], 1 }

</bundles_post_ra>
